<compile_context>
chip_gen: v5e
topology: v5e:2x2
jax: 0.10.0
libtpu: 0.0.40
codegen_flags: <defaults>
</compile_context>

<pallas_src>
import functools
import math

import jax
import jax.numpy as jnp
from jax.experimental import pallas as pl
from jax.experimental.pallas import tpu as pltpu

_LANE = 128
_H_RESIDENT_BYTES = 8 * 1024 * 1024       # keep resident H (x2 buffers) << VMEM budget
_VMEM_LIMIT_BYTES = 48 * 1024 * 1024      # safe on v7x (64 MiB) and v5e/v6e (128 MiB)


def _round_up(x, m):
    return ((x + m - 1) // m) * m


def _pad2d(x, rows, cols):
    r, c = x.shape
    if r == rows and c == cols:
        return x
    return jnp.pad(x, ((0, rows - r), (0, cols - c)))


def _sage_layer_kernel(*refs, apply_relu, resident, tm, tk):
    if resident:
        (adj_ref, h_ref, inv_deg_ref, w_self_ref, w_neigh_ref, b_ref,
         out_ref, acc_ref) = refs
    else:
        (adj_ref, h_nbr_ref, h_self_ref, inv_deg_ref, w_self_ref, w_neigh_ref,
         b_ref, out_ref, acc_ref) = refs

    i = pl.program_id(0)
    k = pl.program_id(1)
    nk = pl.num_programs(1)

    @pl.when(k == 0)
    def _init():
        acc_ref[...] = jnp.zeros_like(acc_ref)

    # Partial neighbor-sum on the MXU: binary adj tile (tm,tk) @ H tile (tk,F).
    if resident:
        h_nbr = h_ref[pl.ds(pl.multiple_of(k * tk, tk), tk), :]
    else:
        h_nbr = h_nbr_ref[...]
    acc_ref[...] += jnp.dot(adj_ref[...], h_nbr, preferred_element_type=jnp.float32)

    @pl.when(k == nk - 1)
    def _finalize():
        if resident:
            h_self = h_ref[pl.ds(pl.multiple_of(i * tm, tm), tm), :]
        else:
            h_self = h_self_ref[...]
        # Mean normalization in f32 (exact per-row scale, VPU-cheap).
        h_neigh = acc_ref[...] * inv_deg_ref[...]
        # Two K=F dots instead of concat + fused dot (no (tm,2F) VMEM temp).
        out = jnp.dot(h_self, w_self_ref[...], preferred_element_type=jnp.float32)
        out = out + jnp.dot(h_neigh.astype(w_neigh_ref.dtype), w_neigh_ref[...],
                            preferred_element_type=jnp.float32)
        out = out + b_ref[...]
        if apply_relu:
            out = jnp.maximum(out, 0.0)
        out_ref[...] = out.astype(out_ref.dtype)


def sage_conv(adj, h, inv_deg, w_self, w_neigh, bias, *, apply_relu, out_dtype,
              tm, tk, h_resident):
    """One SAGEConv (mean aggregator) layer, tiled over (node rows, neighbor K)."""
    n = adj.shape[0]
    f_in = h.shape[1]           # padded to multiple of 128
    f_out = w_self.shape[1]     # padded to multiple of 128
    grid = (n // tm, n // tk)

    kernel = functools.partial(_sage_layer_kernel, apply_relu=apply_relu,
                               resident=h_resident, tm=tm, tk=tk)

    common_specs = [
        pl.BlockSpec((tm, 1), lambda i, k: (i, 0)),          # inv_deg (per-row f32 scale)
        pl.BlockSpec((f_in, f_out), lambda i, k: (0, 0)),    # W_self (resident)
        pl.BlockSpec((f_in, f_out), lambda i, k: (0, 0)),    # W_neigh (resident)
        pl.BlockSpec((1, f_out), lambda i, k: (0, 0)),       # bias (resident)
    ]
    if h_resident:
        in_specs = [
            pl.BlockSpec((tm, tk), lambda i, k: (i, k)),     # adjacency tile (streamed)
            pl.BlockSpec((n, f_in), lambda i, k: (0, 0)),    # H fully resident in VMEM
        ] + common_specs
        operands = (adj, h, inv_deg, w_self, w_neigh, bias)
    else:
        in_specs = [
            pl.BlockSpec((tm, tk), lambda i, k: (i, k)),     # adjacency tile
            pl.BlockSpec((tk, f_in), lambda i, k: (k, 0)),   # H neighbor tile
            pl.BlockSpec((tm, f_in), lambda i, k: (i, 0)),   # H self tile (resident over k)
        ] + common_specs
        operands = (adj, h, h, inv_deg, w_self, w_neigh, bias)

    return pl.pallas_call(
        kernel,
        out_shape=jax.ShapeDtypeStruct((n, f_out), out_dtype),
        grid=grid,
        in_specs=in_specs,
        out_specs=pl.BlockSpec((tm, f_out), lambda i, k: (i, 0)),
        scratch_shapes=[pltpu.VMEM((tm, f_in), jnp.float32)],  # A@H accumulator
        compiler_params=pltpu.CompilerParams(
            dimension_semantics=("parallel", "arbitrary"),
            vmem_limit_bytes=_VMEM_LIMIT_BYTES),
    )(*operands)


def _pad_layer_params(ws, wn, b):
    """Zero-pad feature dims to 128 multiples; weights bf16, bias f32."""
    d_in, d_out = ws.shape
    d_in_p = _round_up(d_in, _LANE)
    d_out_p = _round_up(d_out, _LANE)
    wsp = _pad2d(ws, d_in_p, d_out_p).astype(jnp.bfloat16)
    wnp = _pad2d(wn, d_in_p, d_out_p).astype(jnp.bfloat16)
    bp = _pad2d(b, 1, d_out_p).astype(jnp.float32)
    return wsp, wnp, bp


def graphsage_forward(adj_bin, inv_deg, features, params, *, tile_m=1024, tile_k=2048):
    """params: list of (w_self, w_neigh, bias); relu on all but last layer.

    adj_bin: un-normalized binary adjacency (no self-loops); inv_deg: (N,1) f32.
    """
    n, f_in = features.shape
    n_classes = params[-1][0].shape[1]

    # Tile selection: pad N UP to a multiple of the tiles (exact), never shrink
    # tiles down to 128 for awkward N.
    tm = min(tile_m, _round_up(n, _LANE))
    tk = min(tile_k, _round_up(n, _LANE))
    n_pad = _round_up(n, math.lcm(tm, tk))
    # TODO(synk): on v7x, n_pad//tm >= 2 (and even) is needed for both TensorCores
    # to engage on the parallel row axis; not reachable at this demo size.

    f_in_pad = _round_up(f_in, _LANE)

    # One-time casts/pads in the wrapper (not per layer). Binary 0/1 is exact in bf16.
    adj_p = _pad2d(adj_bin, n_pad, n_pad).astype(jnp.bfloat16)
    inv_deg_p = _pad2d(inv_deg, n_pad, 1).astype(jnp.float32)
    h = _pad2d(features, n_pad, f_in_pad).astype(jnp.bfloat16)

    n_layers = len(params)
    for li, (ws, wn, b) in enumerate(params):
        last = li == n_layers - 1
        wsp, wnp, bp = _pad_layer_params(ws, wn, b)
        h_resident = (h.shape[0] * h.shape[1] * h.dtype.itemsize) <= _H_RESIDENT_BYTES
        h = sage_conv(adj_p, h, inv_deg_p, wsp, wnp, bp,
                      apply_relu=not last,
                      out_dtype=jnp.float32 if last else jnp.bfloat16,
                      tm=tm, tk=tk, h_resident=h_resident)
    return h[:n, :n_classes]


def init_params(key, in_feats, n_hidden, n_classes, n_layers):
    """GraphSAGE stack: in->hidden, (n_layers-1) x hidden->hidden, hidden->classes."""
    dims = [(in_feats, n_hidden)]
    dims += [(n_hidden, n_hidden)] * (n_layers - 1)
    dims += [(n_hidden, n_classes)]
    params = []
    for (d_in, d_out) in dims:
        key, k1, k2 = jax.random.split(key, 3)
        ws = jax.random.normal(k1, (d_in, d_out), jnp.float32) * 0.1
        wn = jax.random.normal(k2, (d_in, d_out), jnp.float32) * 0.1
        b = jnp.zeros((1, d_out), jnp.float32)
        params.append((ws, wn, b))
    return params


def build_graph(key, n_nodes):
    """Random undirected graph: binary adjacency (no self-loops) + 1/deg column.

    DGL SAGEConv('mean') aggregates neighbors only (self handled by W_self) and
    clamps in-degree to >= 1.
    """
    a = jax.random.bernoulli(key, p=0.1, shape=(n_nodes, n_nodes)).astype(jnp.float32)
    a = jnp.maximum(a, a.T)                               # undirected
    a = a * (1.0 - jnp.eye(n_nodes, dtype=jnp.float32))   # drop self-loops
    deg = jnp.clip(jnp.sum(a, axis=1, keepdims=True), 1.0, None)
    return a, 1.0 / deg


if __name__ == "__main__":
    # GraphSAGE(in_feats=32, n_hidden=32, n_classes=8, n_layers=2,
    #           activation=relu, dropout=0.5, aggregator_type='mean')
    N_NODES, IN_FEATS, N_HIDDEN, N_CLASSES, N_LAYERS = 128, 32, 32, 8, 2

    root = jax.random.PRNGKey(0)
    k_graph, k_feat, k_param = jax.random.split(root, 3)

    adj_bin, inv_deg = build_graph(k_graph, N_NODES)
    features = jax.random.normal(k_feat, (N_NODES, IN_FEATS), jnp.float32)
    params = init_params(k_param, IN_FEATS, N_HIDDEN, N_CLASSES, N_LAYERS)

    out = graphsage_forward(adj_bin, inv_deg, features, params)
    out = jax.block_until_ready(out)
    assert out.shape == (N_NODES, N_CLASSES), out.shape

    # Pure-JAX f32 reference (same math, no Pallas). Tolerance covers bf16 feature/
    # weight operands (accumulation is f32, mean normalization is exact f32).
    adj_norm = adj_bin * inv_deg
    h_ref = features
    for li, (ws, wn, b) in enumerate(params):
        hn = adj_norm @ h_ref
        h_ref = h_ref @ ws + hn @ wn + b
        if li < len(params) - 1:
            h_ref = jnp.maximum(h_ref, 0.0)
    max_err = jnp.max(jnp.abs(out - h_ref))
    assert jnp.allclose(out, h_ref, atol=3e-2, rtol=3e-2), max_err

    print("KERNEL_OK")
</pallas_src>

<mosaic_0001>
module attributes {stable_mosaic.version = 11 : i64} {
  func.func @_sage_layer_kernel(%arg0: i32, %arg1: i32, %arg2: memref<128x128xbf16, #tpu.memory_space<vmem>>, %arg3: memref<128x128xbf16, #tpu.memory_space<vmem>>, %arg4: memref<128x1xf32, #tpu.memory_space<vmem>>, %arg5: memref<128x128xbf16, #tpu.memory_space<vmem>>, %arg6: memref<128x128xbf16, #tpu.memory_space<vmem>>, %arg7: memref<1x128xf32, #tpu.memory_space<vmem>>, %arg8: memref<128x128xbf16, #tpu.memory_space<vmem>>, %arg9: memref<128x128xf32, #tpu.memory_space<vmem>>) attributes {dimension_semantics = [#tpu.dimension_semantics<parallel>, #tpu.dimension_semantics<arbitrary>], iteration_bounds = array<i64: 1, 1>, scalar_prefetch = 0 : i64, scratch_operands = 1 : i64, tpu.core_type = #tpu.core_type<tc>, window_params = [{transform_indices = @transform_0, window_bounds = array<i64: 128, 128>}, {pipeline_mode = #tpu.pipeline_mode<synchronous>, transform_indices = @transform_1, window_bounds = array<i64: 128, 128>}, {transform_indices = @transform_2, window_bounds = array<i64: 128, 1>}, {pipeline_mode = #tpu.pipeline_mode<synchronous>, transform_indices = @transform_3, window_bounds = array<i64: 128, 128>}, {pipeline_mode = #tpu.pipeline_mode<synchronous>, transform_indices = @transform_4, window_bounds = array<i64: 128, 128>}, {pipeline_mode = #tpu.pipeline_mode<synchronous>, transform_indices = @transform_5, window_bounds = array<i64: 1, 128>}, {transform_indices = @transform_6, window_bounds = array<i64: 128, 128>}]} {
    %c0_i32 = arith.constant 0 : i32
    %0 = arith.cmpi eq, %arg1, %c0_i32 : i32
    %1 = arith.extui %0 : i1 to i32
    %c0_i32_0 = arith.constant 0 : i32
    %2 = arith.cmpi ne, %1, %c0_i32_0 : i32
    scf.if %2 {
      %cst_9 = arith.constant 0.000000e+00 : f32
      %15 = vector.broadcast %cst_9 : f32 to vector<128x128xf32>
      %c0_10 = arith.constant 0 : index
      %c0_11 = arith.constant 0 : index
      %16 = vector.load %arg9[%c0_10, %c0_11] : memref<128x128xf32, #tpu.memory_space<vmem>>, vector<128x128xf32>
      tpu.vector_store %arg9[%c0_10, %c0_11], %15 {strides = array<i32>} : memref<128x128xf32, #tpu.memory_space<vmem>>, vector<128x128xf32>,
    } else {
    }
    %c128_i32 = arith.constant 128 : i32
    %3 = arith.muli %arg1, %c128_i32 : i32
    %4 = tpu.assume_multiple %3, 128 : i32
    %5 = arith.index_cast %4 : i32 to index
    %c0 = arith.constant 0 : index
    %6 = vector.load %arg3[%5, %c0] : memref<128x128xbf16, #tpu.memory_space<vmem>>, vector<128x128xbf16>
    %c0_1 = arith.constant 0 : index
    %c0_2 = arith.constant 0 : index
    %7 = vector.load %arg9[%c0_1, %c0_2] : memref<128x128xf32, #tpu.memory_space<vmem>>, vector<128x128xf32>
    %c0_3 = arith.constant 0 : index
    %c0_4 = arith.constant 0 : index
    %8 = vector.load %arg2[%c0_3, %c0_4] : memref<128x128xbf16, #tpu.memory_space<vmem>>, vector<128x128xbf16>
    %cst = arith.constant dense<0.000000e+00> : vector<128x128xf32>
    %9 = tpu.matmul %8, %6, %cst {dimension_numbers = #tpu.dot_dimension_numbers<[1], [0], [0], [1], [0, 0, 1, 1], [], []>} : vector<128x128xbf16>, vector<128x128xbf16>, vector<128x128xf32> -> vector<128x128xf32>
    %10 = arith.addf %7, %9 : vector<128x128xf32>
    %c0_5 = arith.constant 0 : index
    %c0_6 = arith.constant 0 : index
    %11 = vector.load %arg9[%c0_5, %c0_6] : memref<128x128xf32, #tpu.memory_space<vmem>>, vector<128x128xf32>
    tpu.vector_store %arg9[%c0_5, %c0_6], %10 {strides = array<i32>} : memref<128x128xf32, #tpu.memory_space<vmem>>, vector<128x128xf32>,
    %c0_i32_7 = arith.constant 0 : i32
    %12 = arith.cmpi eq, %arg1, %c0_i32_7 : i32
    %13 = arith.extui %12 : i1 to i32
    %c0_i32_8 = arith.constant 0 : i32
    %14 = arith.cmpi ne, %13, %c0_i32_8 : i32
    scf.if %14 {
      %c128_i32_9 = arith.constant 128 : i32
      %15 = arith.muli %arg0, %c128_i32_9 : i32
      %16 = tpu.assume_multiple %15, 128 : i32
      %17 = arith.index_cast %16 : i32 to index
      %c0_10 = arith.constant 0 : index
      %18 = vector.load %arg3[%17, %c0_10] : memref<128x128xbf16, #tpu.memory_space<vmem>>, vector<128x128xbf16>
      %c0_11 = arith.constant 0 : index
      %c0_12 = arith.constant 0 : index
      %19 = vector.load %arg9[%c0_11, %c0_12] : memref<128x128xf32, #tpu.memory_space<vmem>>, vector<128x128xf32>
      %c0_13 = arith.constant 0 : index
      %c0_14 = arith.constant 0 : index
      %20 = vector.load %arg4[%c0_13, %c0_14] : memref<128x1xf32, #tpu.memory_space<vmem>>, vector<128x1xf32>
      %21 = vector.broadcast %20 : vector<128x1xf32> to vector<128x128xf32>
      %22 = arith.mulf %19, %21 : vector<128x128xf32>
      %c0_15 = arith.constant 0 : index
      %c0_16 = arith.constant 0 : index
      %23 = vector.load %arg5[%c0_15, %c0_16] : memref<128x128xbf16, #tpu.memory_space<vmem>>, vector<128x128xbf16>
      %cst_17 = arith.constant dense<0.000000e+00> : vector<128x128xf32>
      %24 = tpu.matmul %18, %23, %cst_17 {dimension_numbers = #tpu.dot_dimension_numbers<[1], [0], [0], [1], [0, 0, 1, 1], [], []>} : vector<128x128xbf16>, vector<128x128xbf16>, vector<128x128xf32> -> vector<128x128xf32>
      %25 = arith.truncf %22 : vector<128x128xf32> to vector<128x128xbf16>
      %c0_18 = arith.constant 0 : index
      %c0_19 = arith.constant 0 : index
      %26 = vector.load %arg6[%c0_18, %c0_19] : memref<128x128xbf16, #tpu.memory_space<vmem>>, vector<128x128xbf16>
      %cst_20 = arith.constant dense<0.000000e+00> : vector<128x128xf32>
      %27 = tpu.matmul %25, %26, %cst_20 {dimension_numbers = #tpu.dot_dimension_numbers<[1], [0], [0], [1], [0, 0, 1, 1], [], []>} : vector<128x128xbf16>, vector<128x128xbf16>, vector<128x128xf32> -> vector<128x128xf32>
      %28 = arith.addf %24, %27 : vector<128x128xf32>
      %c0_21 = arith.constant 0 : index
      %c0_22 = arith.constant 0 : index
      %29 = vector.load %arg7[%c0_21, %c0_22] : memref<1x128xf32, #tpu.memory_space<vmem>>, vector<1x128xf32>
      %30 = vector.broadcast %29 : vector<1x128xf32> to vector<128x128xf32>
      %31 = arith.addf %28, %30 : vector<128x128xf32>
      %cst_23 = arith.constant 0.000000e+00 : f32
      %32 = vector.broadcast %cst_23 : f32 to vector<128x128xf32>
      %33 = arith.maximumf %31, %32 : vector<128x128xf32>
      %34 = arith.truncf %33 : vector<128x128xf32> to vector<128x128xbf16>
      %c0_24 = arith.constant 0 : index
      %c0_25 = arith.constant 0 : index
      %35 = vector.load %arg8[%c0_24, %c0_25] : memref<128x128xbf16, #tpu.memory_space<vmem>>, vector<128x128xbf16>
      tpu.vector_store %arg8[%c0_24, %c0_25], %34 {strides = array<i32>} : memref<128x128xbf16, #tpu.memory_space<vmem>>, vector<128x128xbf16>,
    } else {
    }
    return
  }
  func.func @transform_0(%arg0: i32, %arg1: i32) -> (i32, i32) {
    %c0_i32 = arith.constant 0 : i32
    return %arg0, %arg1 : i32, i32
  }
  func.func @transform_1(%arg0: i32, %arg1: i32) -> (i32, i32) {
    %c0_i32 = arith.constant 0 : i32
    %c0_i32_0 = arith.constant 0 : i32
    %c0_i32_1 = arith.constant 0 : i32
    return %c0_i32, %c0_i32_0 : i32, i32
  }
  func.func @transform_2(%arg0: i32, %arg1: i32) -> (i32, i32) {
    %c0_i32 = arith.constant 0 : i32
    %c0_i32_0 = arith.constant 0 : i32
    return %arg0, %c0_i32 : i32, i32
  }
  func.func @transform_3(%arg0: i32, %arg1: i32) -> (i32, i32) {
    %c0_i32 = arith.constant 0 : i32
    %c0_i32_0 = arith.constant 0 : i32
    %c0_i32_1 = arith.constant 0 : i32
    return %c0_i32, %c0_i32_0 : i32, i32
  }
  func.func @transform_4(%arg0: i32, %arg1: i32) -> (i32, i32) {
    %c0_i32 = arith.constant 0 : i32
    %c0_i32_0 = arith.constant 0 : i32
    %c0_i32_1 = arith.constant 0 : i32
    return %c0_i32, %c0_i32_0 : i32, i32
  }
  func.func @transform_5(%arg0: i32, %arg1: i32) -> (i32, i32) {
    %c0_i32 = arith.constant 0 : i32
    %c0_i32_0 = arith.constant 0 : i32
    %c0_i32_1 = arith.constant 0 : i32
    return %c0_i32, %c0_i32_0 : i32, i32
  }
  func.func @transform_6(%arg0: i32, %arg1: i32) -> (i32, i32) {
    %c0_i32 = arith.constant 0 : i32
    %c0_i32_0 = arith.constant 0 : i32
    return %arg0, %c0_i32 : i32, i32
  }
}

</mosaic_0001>

<bundles_post_ra>
// kernel: tpu_custom_call.1
= control target key start
LH: loop header
LB: loop body
LE: loop exit
PB: predicated region body
PF: predicated region fallthrough
CT: control target
= control target key end

     0   :  { %11 = vsyncpa [#allocation4], 0  ;;  %s1391_s0 = inlined_call_operand.vmem [shape: bf16[128,128], index: 0, kind: input, shape index: {}]   ;;  %s1392_s1 = inlined_call_operand.vmem [shape: bf16[128,128], index: 1, kind: input, shape index: {}]   ;;  %s1393_s2 = inlined_call_operand.vmem [shape: f32[128,1], index: 2, kind: input, shape index: {}]   ;;  %s1394_s3 = inlined_call_operand.hbm [shape: bf16[128,128], index: 3, kind: input, shape index: {}]   ;;  %s1395_s4 = inlined_call_operand.hbm [shape: bf16[128,128], index: 4, kind: input, shape index: {}]   ;;  %s1396_s5 = inlined_call_operand.vmem [shape: f32[1,128], index: 5, kind: input, shape index: {}]   ;;  %s1397_s6 = inlined_call_operand.hbm [shape: bf16[128,128], index: 6, kind: output, shape index: {}]  }
   0x1   :  { %12 = vsyncpa [#allocation7], 0 }
   0x2   :  { %13 = vsyncpa [#allocation5], 0  ;;  %s24_s23 = sshll.u32 %s1394_s3, 4  ;;  %s1191_s24 = smov [#allocation3]   ;;  %s25_s23 = int_to_ptr.hbm [resolvable:$true] %s24_s23 }
   0x3   :  { %s26_s25 = sshll.u32 %s1191_s24, 4  ;;  %s37_s28 = sshll.u32 %s1395_s4, 4  ;;  %s27_s25 = int_to_ptr.vmem [resolvable:$true] %s26_s25  ;;  %s38_s28 = int_to_ptr.hbm [resolvable:$true] %s37_s28 }
   0x4   :  { %s1192_s29 = smov 64   ;;  %s1193_s30 = smov 4  }
   0x5   :  { %32 = dma.hbm_to_vmem [thread:$0]  %s25_s23, 1024, %s27_s25, [#allocation4], %s1192_s29, %s1192_s29, %s1193_s30  }
   0x6   :  { %s1194_s7 = smov [#allocation6]  }
   0x7   :  { %s39_s8 = sshll.u32 %s1194_s7, 4  ;;  %s40_s8 = int_to_ptr.vmem [resolvable:$true] %s39_s8 }
   0x8   :  { %45 = dma.hbm_to_vmem [thread:$0]  %s38_s28, 1024, %s40_s8, [#allocation7], %s1192_s29, %s1192_s29, %s1193_s30  }
   0x9   :  { %1185 = dma.done.wait [#allocation4], 1024  }
   0xa   :  { %1186 = vsyncadd [#allocation4], 4294966272 }
   0xb   :  { %1187 = dma.done.wait [#allocation7], 1024  }
   0xc   :  { %1188 = vsyncadd [#allocation7], 4294966272  ;;  %v1195_v0 = vmov 0   ;;  %v999_v1 = vld [vmem:[%s1392_s1 + $0x38] sm:$0xff]  ;;  %v346_v2 = vld [vmem:[%s1393_s2] sm:$0xff]  ;;  %s814_s17 = sshll.u32 %s1397_s6, 4  ;;  %s815_s17 = int_to_ptr.hbm [resolvable:$true] %s814_s17 }
   0xd   :  { %1109 = vset.pattern.permute.xlu0 %v1195_v0  ;;  %1110 = vset.pattern.permute.xlu1 %v1195_v0  ;;  %v998_v3 = vld [vmem:[%s1392_s1 + $0x30] sm:$0xff]  ;;  %v997_v5 = vld [vmem:[%s1392_s1 + $0x28] sm:$0xff]  ;;  %v349_v7 = vld [vmem:[%s1393_s2 + $0x18] sm:$0xff] }
   0xe   :  { %1111 = vset.pattern.permute.xlu2 %v1195_v0  ;;  %364 = vperm.xlu0 %1109, %v346_v2   ;;  %v348_v4 = vld [vmem:[%s1393_s2 + $0x10] sm:$0xff]  ;;  %v347_v6 = vld [vmem:[%s1393_s2 + $0x8] sm:$0xff]  ;;  %v996_v8 = vld [vmem:[%s1392_s1 + $0x20] sm:$0xff] }
   0xf   :  { %225 = vmatpush.bf16.msra.mxu0 %v999_v1  ;;  %1079 = vmatpush.bf16.msra.mxu3 %v999_v1  ;;  %v995_v9 = vld [vmem:[%s1392_s1 + $0x18] sm:$0xff]  ;;  %v350_v10 = vld [vmem:[%s1393_s2 + $0x20] sm:$0xff]  ;;  %v351_v11 = vld [vmem:[%s1393_s2 + $0x28] sm:$0xff] }
  0x10   :  { %374 = vperm.xlu1 %1110, %v348_v4   ;;  %v358_v12 = vld [vmem:[%s1393_s2 + $0x60] sm:$0xff]  ;;  %v994_v13 = vld [vmem:[%s1392_s1 + $0x10] sm:$0xff]  ;;  %v993_v14 = vld [vmem:[%s1392_s1 + $0x8] sm:$0xff] }
  0x11   :  { %424 = vperm.xlu2 %1111, %v358_v12   ;;  %v361_v15 = vld [vmem:[%s1393_s2 + $0x78] sm:$0xff]  ;;  %v352_v16 = vld [vmem:[%s1393_s2 + $0x30] sm:$0xff]  ;;  %v992_v17 = vld [vmem:[%s1392_s1] sm:$0xff] }
  0x12   :  { %v1000_v18 = vld [vmem:[%s1391_s0] sm:$0xff]  ;;  %v1006_v19 = vld [vmem:[%s1391_s0 + $0x30] sm:$0xff]  ;;  %v355_v21 = vld [vmem:[%s1393_s2 + $0x48] sm:$0xff] }
  0x13   :  { %226 = vmatpush.bf16.msra.mxu0 %v998_v3  ;;  %1080 = vmatpush.bf16.msra.mxu3 %v998_v3  ;;  %v354_v20 = vld [vmem:[%s1393_s2 + $0x40] sm:$0xff]  ;;  %v359_v22 = vld [vmem:[%s1393_s2 + $0x68] sm:$0xff]  ;;  %v357_v23 = vld [vmem:[%s1393_s2 + $0x58] sm:$0xff] }
  0x14   :  { %v360_v24 = vld [vmem:[%s1393_s2 + $0x70] sm:$0xff]  ;;  %v1001_v25 = vld [vmem:[%s1391_s0 + $0x8] sm:$0xff]  ;;  %v1007_v26 = vld [vmem:[%s1391_s0 + $0x38] sm:$0xff] }
  0x15   :  { %v353_v27 = vld [vmem:[%s1393_s2 + $0x38] sm:$0xff]  ;;  %v356_v28 = vld [vmem:[%s1393_s2 + $0x50] sm:$0xff]  ;;  %v1004_v33 = vld [vmem:[%s1391_s0 + $0x20] sm:$0xff] }
  0x16   :  { %369 = vperm.xlu0 %1109, %v347_v6   ;;  %v1002_v29 = vld [vmem:[%s1391_s0 + $0x10] sm:$0xff]  ;;  %v1003_v30 = vld [vmem:[%s1391_s0 + $0x18] sm:$0xff]  ;;  %v1021_v34 = vld [vmem:[#allocation3 + $0x28] sm:$0xff] }
  0x17   :  { %227 = vmatpush.bf16.msra.mxu0 %v997_v5  ;;  %1081 = vmatpush.bf16.msra.mxu3 %v997_v5  ;;  %v1023_v31 = vld [vmem:[#allocation3 + $0x38] sm:$0xff]  ;;  %v1022_v32 = vld [vmem:[#allocation3 + $0x30] sm:$0xff]  ;;  %v1020_v35 = vld [vmem:[#allocation3 + $0x20] sm:$0xff] }
  0x18   :  { %379 = vperm.xlu1 %1110, %v349_v7   ;;  %691 = vmatpush.bf16.msra.mxu2 %v1023_v31  ;;  %v1031_v36 = vld [vmem:[#allocation6 + $0x38] sm:$0xff]  ;;  %v1030_v38 = vld [vmem:[#allocation6 + $0x30] sm:$0xff]  ;;  %v1005_v40 = vld [vmem:[%s1391_s0 + $0x28] sm:$0xff] }
  0x19   :  { %429 = vperm.xlu2 %1111, %v359_v22   ;;  %546 = vmatpush.bf16.msra.mxu1 %v1031_v36  ;;  %v1019_v37 = vld [vmem:[#allocation3 + $0x18] sm:$0xff]  ;;  %v1018_v39 = vld [vmem:[#allocation3 + $0x10] sm:$0xff]  ;;  %v1029_v41 = vld [vmem:[#allocation6 + $0x28] sm:$0xff] }
  0x1a   :  { %v1017_v42 = vld [vmem:[#allocation3 + $0x8] sm:$0xff]  ;;  %v1028_v43 = vld [vmem:[#allocation6 + $0x20] sm:$0xff]  ;;  %v1027_v46 = vld [vmem:[#allocation6 + $0x18] sm:$0xff] }
  0x1b   :  { %228 = vmatpush.bf16.msra.mxu0 %v996_v8  ;;  %1082 = vmatpush.bf16.msra.mxu3 %v996_v8  ;;  %v1016_v44 = vld [vmem:[#allocation3] sm:$0xff]  ;;  %v1026_v47 = vld [vmem:[#allocation6 + $0x10] sm:$0xff]  ;;  %v1025_v48 = vld [vmem:[#allocation6 + $0x8] sm:$0xff] }
  0x1c   :  { %692 = vmatpush.bf16.msra.mxu2 %v1022_v32  ;;  %v1008_v45 = vld [vmem:[%s1392_s1] sm:$0xff]  ;;  %v1009_v50 = vld [vmem:[%s1392_s1 + $0x8] sm:$0xff]  ;;  %v1010_v51 = vld [vmem:[%s1392_s1 + $0x10] sm:$0xff] }
  0x1d   :  { %547 = vmatpush.bf16.msra.mxu1 %v1030_v38  ;;  %v1024_v49 = vld [vmem:[#allocation6] sm:$0xff]  ;;  %v1011_v63 = vld [vmem:[%s1392_s1 + $0x18] sm:$0xff] }
  0x1e   :  { %384 = vperm.xlu0 %1109, %v350_v10  }
  0x1f   :  { %229 = vmatpush.bf16.msra.mxu0 %v995_v9  ;;  %1083 = vmatpush.bf16.msra.mxu3 %v995_v9 }
  0x20   :  { %389 = vperm.xlu1 %1110, %v351_v11   ;;  %693 = vmatpush.bf16.msra.mxu2 %v1021_v34 }
  0x21   :  { %434 = vperm.xlu2 %1111, %v360_v24   ;;  %548 = vmatpush.bf16.msra.mxu1 %v1029_v41 }
  0x23   :  { %230 = vmatpush.bf16.msra.mxu0 %v994_v13  ;;  %1084 = vmatpush.bf16.msra.mxu3 %v994_v13  ;;  %v1012_v13 = vld [vmem:[%s1392_s1 + $0x20] sm:$0xff] }
  0x24   :  { %694 = vmatpush.bf16.msra.mxu2 %v1020_v35 }
  0x25   :  { %549 = vmatpush.bf16.msra.mxu1 %v1028_v43 }
  0x26   :  { %439 = vperm.xlu0 %1109, %v361_v15  }
  0x27   :  { %231 = vmatpush.bf16.msra.mxu0 %v993_v14  ;;  %1085 = vmatpush.bf16.msra.mxu3 %v993_v14 }
  0x28   :  { %394 = vperm.xlu1 %1110, %v352_v16   ;;  %695 = vmatpush.bf16.msra.mxu2 %v1019_v37 }
  0x29   :  { %399 = vperm.xlu2 %1111, %v353_v27   ;;  %550 = vmatpush.bf16.msra.mxu1 %v1027_v46 }
  0x2b   :  { %232 = vmatpush.bf16.msra.mxu0 %v992_v17  ;;  %1086 = vmatpush.bf16.msra.mxu3 %v992_v17 }
  0x2c   :  { %696 = vmatpush.bf16.msra.mxu2 %v1018_v39 }
  0x2d   :  { %551 = vmatpush.bf16.msra.mxu1 %v1026_v47 }
  0x2e   :  { %233 = vmatmul.bf16.vlgmr.msra.gmra.mxu0 %v1000_v18  ;;  %263 = vmatmul.bf16.vlgmr.msra.gmra.mxu3 %v1006_v19 }
  0x2f   :  { %404 = vperm.xlu0 %1109, %v354_v20   ;;  %1087 = vmatpush.bf16.msrb.mxu3 %v1031_v36 }
  0x30   :  { %409 = vperm.xlu1 %1110, %v355_v21   ;;  %697 = vmatpush.bf16.msra.mxu2 %v1017_v42 }
  0x31   :  { %414 = vperm.xlu2 %1111, %v356_v28   ;;  %552 = vmatpush.bf16.msra.mxu1 %v1025_v48 }
  0x33   :  { %1088 = vmatpush.bf16.msrb.mxu3 %v1030_v38 }
  0x34   :  { %698 = vmatpush.bf16.msra.mxu2 %v1016_v44 }
  0x35   :  { %553 = vmatpush.bf16.msra.mxu1 %v1024_v49 }
  0x37   :  { %419 = vperm.xlu0 %1109, %v357_v23   ;;  %1089 = vmatpush.bf16.msrb.mxu3 %v1029_v41 }
  0x38   :  { %699 = vmatmul.bf16.vlgmr.msra.gmra.mxu2 %v1008_v45 }
  0x3b   :  { %1090 = vmatpush.bf16.msrb.mxu3 %v1028_v43 }
  0x3e   :  { %238 = vmatmul.bf16.gmra.mxu0 %v1001_v25  ;;  %268 = vmatmul.bf16.gmra.mxu3 %v1007_v26  ;;  %v1013_v25 = vld [vmem:[%s1392_s1 + $0x28] sm:$0xff]  ;;  %v1014_v26 = vld [vmem:[%s1392_s1 + $0x30] sm:$0xff] }
  0x3f   :  { %1091 = vmatpush.bf16.msrb.mxu3 %v1027_v46 }
  0x43   :  { %1092 = vmatpush.bf16.msrb.mxu3 %v1026_v47 }
  0x47   :  { %1093 = vmatpush.bf16.msrb.mxu3 %v1025_v48 }
  0x48   :  { %704 = vmatmul.bf16.gmra.mxu2 %v1009_v50 }
  0x4b   :  { %1094 = vmatpush.bf16.msrb.mxu3 %v1024_v49 }
  0x4e   :  { %243 = vmatmul.bf16.gmra.mxu0 %v1002_v29 }
  0x4f   :  { %1095 = vmatpush.bf16.msra.mxu3 %v1023_v31 }
  0x53   :  { %1096 = vmatpush.bf16.msra.mxu3 %v1022_v32 }
  0x57   :  { %1097 = vmatpush.bf16.msra.mxu3 %v1021_v34  ;;  %v1015_v34 = vld [vmem:[%s1392_s1 + $0x38] sm:$0xff] }
  0x58   :  { %709 = vmatmul.bf16.gmra.mxu2 %v1010_v51 }
  0x5b   :  { %1098 = vmatpush.bf16.msra.mxu3 %v1020_v35 }
  0x5e   :  { %248 = vmatmul.bf16.gmra.mxu0 %v1003_v30 }
  0x5f   :  { %1099 = vmatpush.bf16.msra.mxu3 %v1019_v37 }
  0x63   :  { %1100 = vmatpush.bf16.msra.mxu3 %v1018_v39 }
  0x67   :  { %1101 = vmatpush.bf16.msra.mxu3 %v1017_v42 }
  0x68   :  { %714 = vmatmul.bf16.gmra.mxu2 %v1011_v63 }
  0x6b   :  { %v425_v54 = vpop.permute.xlu2 %424  ;;  %1102 = vmatpush.bf16.msra.mxu3 %v1016_v44 }
  0x6e   :  { %253 = vmatmul.bf16.gmra.mxu0 %v1004_v33 }
  0x73   :  { %v430_v0 = vpop.permute.xlu2 %429 }
  0x78   :  { %719 = vmatmul.bf16.gmra.mxu2 %v1012_v13 }
  0x7b   :  { %v435_v12 = vpop.permute.xlu2 %434 }
  0x7e   :  { %258 = vmatmul.bf16.gmra.mxu0 %v1005_v40 }
  0x80   :  { %v365_v52 = vpop.permute.xlu0 %364 }
  0x82   :  { %v375_v61 = vpop.permute.xlu1 %374 }
  0x83   :  { %v400_v29 = vpop.permute.xlu2 %399 }
  0x88   :  { %v370_v56 = vpop.permute.xlu0 %369  ;;  %724 = vmatmul.bf16.gmra.mxu2 %v1013_v25 }
  0x8a   :  { %v380_v7 = vpop.permute.xlu1 %379 }
  0x8b   :  { %v415_v43 = vpop.permute.xlu2 %414 }
  0x90   :  { %v385_v5 = vpop.permute.xlu0 %384 }
  0x92   :  { %v390_v20 = vpop.permute.xlu1 %389 }
  0x98   :  { %v440_v14 = vpop.permute.xlu0 %439 }
  0x9a   :  { %v395_v28 = vpop.permute.xlu1 %394 }
  0xa1   :  { %v405_v36 = vpop.permute.xlu0 %404 }
  0xa2   :  { %v410_v37 = vpop.permute.xlu1 %409 }
  0xa9   :  { %v420_v44 = vpop.permute.xlu0 %419 }
  0xab   :  { %v234_v53 = vpop.f32.mrf.mxu0 }
  0xac   :  { %v442_v58 = vmul.f32 %v365_v52, %v234_v53 }
  0xb1   :  { %v264_v55 = vpop.f32.mrf.mxu3 }
  0xb2   :  { %v454_v62 = vmul.f32 %v425_v54, %v264_v55  ;;  %v1367_v54 = vld [vmem:[%s1396_s5] ss:$0 sm:$0xff]  ;;  %s1196_s5 = smov [#allocation8]  }
  0xb3   :  { %v236_v57 = vpop.f32.mrf.mxu0  ;;  %s812_s14 = sshll.u32 %s1196_s5, 4  ;;  %s813_s14 = int_to_ptr.vmem [resolvable:$true] %s812_s14 }
  0xb4   :  { %v443_v59 = vmul.f32 %v370_v56, %v236_v57 }
  0xb6   :  { %v474_v60 = vpack.c.bf16 %v443_v59, %v442_v58 }
  0xb8   :  { %554 = vmatmul.bf16.vlgmr.msra.gmra.mxu1 %v474_v60 }
  0xb9   :  { %v266_v1 = vpop.f32.mrf.mxu3 }
  0xba   :  { %v455_v2 = vmul.f32 %v430_v0, %v266_v1 }
  0xbb   :  { %v239_v3 = vpop.f32.mrf.mxu0  ;;  %v700_v49 = vpop.f32.mrf.mxu2 }
  0xbc   :  { %v480_v4 = vpack.c.bf16 %v455_v2, %v454_v62  ;;  %v444_v9 = vmul.f32 %v375_v61, %v239_v3 }
  0xbe   :  { %584 = vmatmul.bf16.vlgmr.msrb.gmra.mxu3 %v480_v4 }
  0xc1   :  { %v269_v6 = vpop.f32.mrf.mxu3 }
  0xc2   :  { %v456_v16 = vmul.f32 %v435_v12, %v269_v6 }
  0xc3   :  { %v241_v8 = vpop.f32.mrf.mxu0  ;;  %v702_v50 = vpop.f32.mrf.mxu2 }
  0xc4   :  { %v445_v10 = vmul.f32 %v380_v7, %v241_v8 }
  0xc6   :  { %v475_v11 = vpack.c.bf16 %v445_v10, %v444_v9 }
  0xc8   :  { %559 = vmatmul.bf16.gmra.mxu1 %v475_v11 }
  0xc9   :  { %v271_v15 = vpop.f32.mrf.mxu3 }
  0xca   :  { %v457_v17 = vmul.f32 %v440_v14, %v271_v15 }
  0xcb   :  { %v244_v18 = vpop.f32.mrf.mxu0  ;;  %v705_v51 = vpop.f32.mrf.mxu2 }
  0xcc   :  { %v481_v19 = vpack.c.bf16 %v457_v17, %v456_v16  ;;  %v446_v22 = vmul.f32 %v385_v5, %v244_v18 }
  0xce   :  { %589 = vmatmul.bf16.gmra.mxu3 %v481_v19 }
  0xd3   :  { %v246_v21 = vpop.f32.mrf.mxu0  ;;  %v707_v56 = vpop.f32.mrf.mxu2 }
  0xd4   :  { %v447_v23 = vmul.f32 %v390_v20, %v246_v21 }
  0xd6   :  { %v476_v24 = vpack.c.bf16 %v447_v23, %v446_v22 }
  0xd8   :  { %564 = vmatmul.bf16.gmra.mxu1 %v476_v24 }
  0xdb   :  { %v249_v27 = vpop.f32.mrf.mxu0  ;;  %v710_v1 = vpop.f32.mrf.mxu2 }
  0xdc   :  { %v448_v31 = vmul.f32 %v395_v28, %v249_v27 }
  0xde   :  { %729 = vmatmul.bf16.vlgmr.msra.gmra.mxu3 %v1014_v26 }
  0xe3   :  { %v251_v30 = vpop.f32.mrf.mxu0  ;;  %v712_v9 = vpop.f32.mrf.mxu2 }
  0xe4   :  { %v449_v32 = vmul.f32 %v400_v29, %v251_v30 }
  0xe6   :  { %v477_v33 = vpack.c.bf16 %v449_v32, %v448_v31 }
  0xe8   :  { %569 = vmatmul.bf16.gmra.mxu1 %v477_v33 }
  0xeb   :  { %v254_v35 = vpop.f32.mrf.mxu0  ;;  %v715_v16 = vpop.f32.mrf.mxu2 }
  0xec   :  { %v450_v39 = vmul.f32 %v405_v36, %v254_v35 }
  0xee   :  { %734 = vmatmul.bf16.gmra.mxu3 %v1015_v34 }
  0xf3   :  { %v256_v38 = vpop.f32.mrf.mxu0  ;;  %v717_v26 = vpop.f32.mrf.mxu2 }
  0xf4   :  { %v451_v40 = vmul.f32 %v410_v37, %v256_v38 }
  0xf6   :  { %v478_v41 = vpack.c.bf16 %v451_v40, %v450_v39 }
  0xf8   :  { %574 = vmatmul.bf16.gmra.mxu1 %v478_v41 }
  0xfb   :  { %v259_v42 = vpop.f32.mrf.mxu0  ;;  %v720_v38 = vpop.f32.mrf.mxu2 }
  0xfc   :  { %v452_v46 = vmul.f32 %v415_v43, %v259_v42 }
 0x103   :  { %v261_v45 = vpop.f32.mrf.mxu0 }
 0x104   :  { %v453_v47 = vmul.f32 %v420_v44, %v261_v45 }
 0x106   :  { %v479_v48 = vpack.c.bf16 %v453_v47, %v452_v46  ;;  %v722_v47 = vpop.f32.mrf.mxu2 }
 0x108   :  { %579 = vmatmul.bf16.gmra.mxu1 %v479_v48 }
 0x135   :  { %v555_v52 = vpop.f32.mrf.mxu1 }
 0x136   :  { %v701_v53 = vadd.f32 %v700_v49, %v555_v52 }
 0x138   :  { %v744_v57 = vadd.f32 %v1367_v54, %v701_v53 }
 0x13a   :  { %v760_v61 = vmax.f32 %v744_v57, 0.0 }
 0x13d   :  { %v557_v55 = vpop.f32.mrf.mxu1 }
 0x13e   :  { %v703_v58 = vadd.f32 %v702_v50, %v557_v55 }
 0x140   :  { %v745_v59 = vadd.f32 %v1367_v54, %v703_v58 }
 0x141   :  { %v585_v60 = vpop.f32.mrf.mxu3 }
 0x142   :  { %v761_v62 = vmax.f32 %v745_v59, 0.0 }
 0x144   :  { %v1035_v63 = vpack.c.bf16 %v761_v62, %v760_v61 }
 0x145   :  { %v560_v0 = vpop.f32.mrf.mxu1 }
 0x146   :  { %1036 = vst [vmem:[#allocation8] sm:$0xff] %v1035_v63   ;;  %v706_v3 = vadd.f32 %v705_v51, %v560_v0  ;;  %v725_v63 = vpop.f32.mrf.mxu2 }
 0x148   :  { %v746_v5 = vadd.f32 %v1367_v54, %v706_v3 }
 0x149   :  { %v587_v2 = vpop.f32.mrf.mxu3 }
 0x14a   :  { %v762_v10 = vmax.f32 %v746_v5, 0.0 }
 0x14d   :  { %v562_v4 = vpop.f32.mrf.mxu1 }
 0x14e   :  { %v708_v6 = vadd.f32 %v707_v56, %v562_v4  ;;  %v727_v3 = vpop.f32.mrf.mxu2 }
 0x150   :  { %v747_v7 = vadd.f32 %v1367_v54, %v708_v6 }
 0x151   :  { %v590_v8 = vpop.f32.mrf.mxu3 }
 0x152   :  { %v763_v11 = vmax.f32 %v747_v7, 0.0 }
 0x154   :  { %v1040_v12 = vpack.c.bf16 %v763_v11, %v762_v10 }
 0x155   :  { %v565_v13 = vpop.f32.mrf.mxu1 }
 0x156   :  { %1072 = vst [vmem:[#allocation8 + $0x8] sm:$0xff] %v1040_v12   ;;  %v711_v15 = vadd.f32 %v710_v1, %v565_v13 }
 0x158   :  { %v748_v18 = vadd.f32 %v1367_v54, %v711_v15 }
 0x159   :  { %v592_v14 = vpop.f32.mrf.mxu3 }
 0x15a   :  { %v764_v22 = vmax.f32 %v748_v18, 0.0 }
 0x15d   :  { %v567_v17 = vpop.f32.mrf.mxu1 }
 0x15e   :  { %v713_v19 = vadd.f32 %v712_v9, %v567_v17 }
 0x160   :  { %v749_v20 = vadd.f32 %v1367_v54, %v713_v19 }
 0x161   :  { %v730_v21 = vpop.f32.mrf.mxu3 }
 0x162   :  { %v765_v23 = vmax.f32 %v749_v20, 0.0  ;;  %v731_v27 = vadd.f32 %v730_v21, %v585_v60 }
 0x164   :  { %v1045_v24 = vpack.c.bf16 %v765_v23, %v764_v22  ;;  %v756_v29 = vadd.f32 %v1367_v54, %v731_v27 }
 0x165   :  { %v570_v25 = vpop.f32.mrf.mxu1 }
 0x166   :  { %1073 = vst [vmem:[#allocation8 + $0x10] sm:$0xff] %v1045_v24   ;;  %v716_v30 = vadd.f32 %v715_v16, %v570_v25  ;;  %v772_v34 = vmax.f32 %v756_v29, 0.0 }
 0x168   :  { %v750_v35 = vadd.f32 %v1367_v54, %v716_v30 }
 0x169   :  { %v732_v28 = vpop.f32.mrf.mxu3 }
 0x16a   :  { %v733_v31 = vadd.f32 %v732_v28, %v587_v2  ;;  %v766_v42 = vmax.f32 %v750_v35, 0.0 }
 0x16c   :  { %v757_v32 = vadd.f32 %v1367_v54, %v733_v31 }
 0x16d   :  { %v572_v33 = vpop.f32.mrf.mxu1 }
 0x16e   :  { %v773_v36 = vmax.f32 %v757_v32, 0.0  ;;  %v718_v37 = vadd.f32 %v717_v26, %v572_v33 }
 0x170   :  { %v1065_v39 = vpack.c.bf16 %v773_v36, %v772_v34  ;;  %v751_v40 = vadd.f32 %v1367_v54, %v718_v37 }
 0x171   :  { %v735_v41 = vpop.f32.mrf.mxu3 }
 0x172   :  { %1077 = vst [vmem:[#allocation8 + $0x30] sm:$0xff] %v1065_v39   ;;  %v767_v43 = vmax.f32 %v751_v40, 0.0  ;;  %v736_v46 = vadd.f32 %v735_v41, %v590_v8 }
 0x174   :  { %v1050_v44 = vpack.c.bf16 %v767_v43, %v766_v42  ;;  %v758_v49 = vadd.f32 %v1367_v54, %v736_v46 }
 0x175   :  { %v575_v45 = vpop.f32.mrf.mxu1 }
 0x176   :  { %1074 = vst [vmem:[#allocation8 + $0x18] sm:$0xff] %v1050_v44   ;;  %v721_v50 = vadd.f32 %v720_v38, %v575_v45  ;;  %v774_v55 = vmax.f32 %v758_v49, 0.0 }
 0x178   :  { %v752_v56 = vadd.f32 %v1367_v54, %v721_v50 }
 0x179   :  { %v737_v48 = vpop.f32.mrf.mxu3 }
 0x17a   :  { %v738_v51 = vadd.f32 %v737_v48, %v592_v14  ;;  %v768_v61 = vmax.f32 %v752_v56, 0.0 }
 0x17c   :  { %v759_v52 = vadd.f32 %v1367_v54, %v738_v51 }
 0x17d   :  { %v577_v53 = vpop.f32.mrf.mxu1 }
 0x17e   :  { %v775_v57 = vmax.f32 %v759_v52, 0.0  ;;  %v723_v58 = vadd.f32 %v722_v47, %v577_v53 }
 0x180   :  { %v1070_v59 = vpack.c.bf16 %v775_v57, %v774_v55  ;;  %v753_v60 = vadd.f32 %v1367_v54, %v723_v58 }
 0x182   :  { %1078 = vst [vmem:[#allocation8 + $0x38] sm:$0xff] %v1070_v59   ;;  %v769_v62 = vmax.f32 %v753_v60, 0.0 }
 0x184   :  { %v1055_v0 = vpack.c.bf16 %v769_v62, %v768_v61 }
 0x185   :  { %v580_v1 = vpop.f32.mrf.mxu1 }
 0x186   :  { %1075 = vst [vmem:[#allocation8 + $0x20] sm:$0xff] %v1055_v0   ;;  %v726_v2 = vadd.f32 %v725_v63, %v580_v1 }
 0x188   :  { %v754_v5 = vadd.f32 %v1367_v54, %v726_v2 }
 0x18a   :  { %v770_v8 = vmax.f32 %v754_v5, 0.0 }
 0x18d   :  { %v582_v4 = vpop.f32.mrf.mxu1 }
 0x18e   :  { %v728_v6 = vadd.f32 %v727_v3, %v582_v4 }
 0x190   :  { %v755_v7 = vadd.f32 %v1367_v54, %v728_v6 }
 0x192   :  { %v771_v9 = vmax.f32 %v755_v7, 0.0 }
 0x194   :  { %v1060_v10 = vpack.c.bf16 %v771_v9, %v770_v8 }
 0x196   :  { %1076 = vst [vmem:[#allocation8 + $0x28] sm:$0xff] %v1060_v10  }
 0x197   :  { %820 = dma.vmem_to_hbm [thread:$0]  %s813_s14, 1024, %s815_s17, [#allocation5], %s1192_s29, %s1192_s29, %s1193_s30  }
 0x198   :  { %1189 = dma.done.wait [#allocation5], 1024  }
 0x199   :  { %1190 = vsyncadd [#allocation5], 4294966272 }
 0x19a   :  { %825 = vsyncpa [#allocation4], 1 }
 0x19b   :  { %826 = vsyncpa [#allocation7], 1 }
 0x19c   :  { %827 = vsyncpa [#allocation5], 1 }

</bundles_post_ra>
